<compile_context>
chip_gen: v5e
topology: v5e:2x2
jax: 0.10.0
libtpu: 0.0.40
codegen_flags: <defaults>
</compile_context>

<pallas_src>
import functools

import jax
import jax.numpy as jnp
import numpy as np
from jax.experimental import pallas as pl
from jax.experimental.pallas import tpu as pltpu


def _round_up(x, m):
    return (x + m - 1) // m * m


def _blstm_step_kernel(gxf_ref, gxr_ref, whh_ref, out_ref, h_ref, c_ref, *,
                       hdp, split_dirs):
    """One fused bidirectional-LSTM timestep for one tile of B sequences.

    Grid = (B_tiles, T); this body runs once per (b_tile, t).

    gxf_ref : (tb, 4*hdp)  forward-direction input gates at time t,
              per-direction column order [i, f, o, g].
    gxr_ref : (tb, 4*hdp)  reverse-direction input gates at original time
              T-1-t (the time flip is done by the BlockSpec index_map).
    whh_ref : (2*hdp, 8*hdp) block-diagonal recurrent weights,
              rows [h_f ; h_r], cols [fwd i,f,o,g | rev i,f,o,g].
    out_ref : (tb, 2*hdp)  [h_f | h_r] for grid step t (reverse half is
              un-flipped in the wrapper's final output permute).
    h_ref, c_ref : (tb, 2*hdp) f32 VMEM carries, persistent across grid steps.
    """
    t = pl.program_id(1)

    @pl.when(t == 0)
    def _init():
        h_ref[...] = jnp.zeros_like(h_ref)
        c_ref[...] = jnp.zeros_like(c_ref)

    h = h_ref[...]
    hb = h.astype(whh_ref.dtype)      # bf16 MXU operands, f32 accumulation

    # TODO(synk): keep the loop-invariant RHS resident in MXU weight registers
    # (pltpu.matmul_push_rhs / matmul_acc_lhs / matmul_pop) instead of
    # re-pushing it via jnp.dot every timestep.
    if split_dirs:
        # hdp >= 128: each direction already fills the MXU contraction; avoid
        # the 50% zero-FLOP waste of the block-diagonal form.
        rec_f = jnp.dot(hb[:, :hdp], whh_ref[0:hdp, 0:4 * hdp],
                        preferred_element_type=jnp.float32)
        rec_r = jnp.dot(hb[:, hdp:], whh_ref[hdp:2 * hdp, 4 * hdp:],
                        preferred_element_type=jnp.float32)
    else:
        rec = jnp.dot(hb, whh_ref[...], preferred_element_type=jnp.float32)
        rec_f, rec_r = rec[:, :4 * hdp], rec[:, 4 * hdp:]

    gates_f = gxf_ref[...].astype(jnp.float32) + rec_f
    gates_r = gxr_ref[...].astype(jnp.float32) + rec_r
    c = c_ref[...]

    def cell(gates, c_half):
        i = jax.nn.sigmoid(gates[:, 0:hdp])
        f = jax.nn.sigmoid(gates[:, hdp:2 * hdp])
        o = jax.nn.sigmoid(gates[:, 2 * hdp:3 * hdp])
        g = jnp.tanh(gates[:, 3 * hdp:4 * hdp])
        c_new = f * c_half + i * g
        return o * jnp.tanh(c_new), c_new

    h_f, c_f = cell(gates_f, c[:, :hdp])
    h_r, c_r = cell(gates_r, c[:, hdp:])

    h_new = jnp.concatenate([h_f, h_r], axis=-1)
    h_ref[...] = h_new
    c_ref[...] = jnp.concatenate([c_f, c_r], axis=-1)
    out_ref[...] = h_new.astype(out_ref.dtype)   # single lane-dense full-width store


def init_blstm_params(key, input_size, hidden_size):
    """PyTorch nn.LSTM-style params (uniform(-k, k), k = 1/sqrt(hidden))."""
    k = 1.0 / np.sqrt(hidden_size)
    names = ["w_ih_f", "w_hh_f", "b_ih_f", "b_hh_f",
             "w_ih_r", "w_hh_r", "b_ih_r", "b_hh_r"]
    shapes = [(4 * hidden_size, input_size), (4 * hidden_size, hidden_size),
              (4 * hidden_size,), (4 * hidden_size,)] * 2
    keys = jax.random.split(key, len(names))
    return {n: jax.random.uniform(kk, s, jnp.float32, minval=-k, maxval=k)
            for n, s, kk in zip(names, shapes, keys)}


def _pack_weights(params, hidden_size, hdp, mxu_dtype):
    """Pack PyTorch-layout LSTM params into the kernel's column order.

    Per-direction gate column order is [i, f, o, g]; slab columns are
    [forward 4*hdp | reverse 4*hdp].  Padded rows/cols are zero, which keeps
    the padded hidden units exactly at h = c = 0 for every timestep.
    """
    hd = hidden_size
    order = ("i", "f", "o", "g")

    def gate_blocks(w):   # PyTorch row order within 4*hd is (i, f, g, o)
        return {"i": w[0:hd], "f": w[hd:2 * hd],
                "g": w[2 * hd:3 * hd], "o": w[3 * hd:4 * hd]}

    w_in_cols, bias_cols = [], []
    for d in ("f", "r"):
        wih = gate_blocks(params[f"w_ih_{d}"])                      # (hd, C)
        b = gate_blocks(params[f"b_ih_{d}"] + params[f"b_hh_{d}"])  # (hd,)
        for g in order:
            w_in_cols.append(jnp.pad(wih[g].T, ((0, 0), (0, hdp - hd))))
            bias_cols.append(jnp.pad(b[g], (0, hdp - hd)))
    w_in = jnp.concatenate(w_in_cols, axis=-1)                      # (C, 8*hdp)
    bias = jnp.concatenate(bias_cols, axis=-1)                      # (8*hdp,)

    def dir_whh(d):                                                 # (hdp, 4*hdp)
        whh = gate_blocks(params[f"w_hh_{d}"])                      # (hd, hd)
        return jnp.concatenate(
            [jnp.pad(whh[g].T, ((0, hdp - hd), (0, hdp - hd))) for g in order],
            axis=-1)

    z = jnp.zeros((hdp, 4 * hdp), jnp.float32)
    w_big = jnp.concatenate(
        [jnp.concatenate([dir_whh("f"), z], axis=-1),
         jnp.concatenate([z, dir_whh("r")], axis=-1)], axis=0)      # (2*hdp, 8*hdp)

    return w_in.astype(mxu_dtype), bias, w_big.astype(mxu_dtype)


@functools.partial(jax.jit, static_argnames=("hidden_size", "block_b"))
def blstm_forward(x_nchw, params, hidden_size, block_b=256):
    """Matches BLSTM.forward: NCHW -> (N, 2*hidden, H, W)."""
    N, C, H, W = x_nchw.shape
    hd = hidden_size
    hdp = _round_up(max(hd, 64), 64)      # 2/4/8*hdp are multiples of 128
    B, T = N * H, W
    mxu_dtype = jnp.bfloat16

    tb = min(block_b, _round_up(B, 8))    # B-tile: target 256 rows for the MXU
    Bp = _round_up(B, tb)
    nb = Bp // tb

    # NCHW -> time-major (T=W, B=N*H, C): each image row is one sequence.
    # (Only the C-wide raw input is permuted; the 8*hdp-wide gate slab is
    #  produced directly in its final layout.)
    x_tbc = jnp.transpose(x_nchw, (3, 0, 2, 1)).reshape(T, B, C)
    if Bp != B:
        x_tbc = jnp.pad(x_tbc, ((0, 0), (0, Bp - B), (0, 0)))

    w_in, bias, w_big = _pack_weights(params, hd, hdp, mxu_dtype)

    # Hoisted input projection for BOTH directions: one bf16 matmul with f32
    # accumulation emits the packed gate slab (T, Bp, 8*hdp).
    gx = jnp.einsum("tbc,cg->tbg", x_tbc.astype(mxu_dtype), w_in,
                    preferred_element_type=jnp.float32)
    gx = (gx + bias).astype(mxu_dtype)

    kernel = functools.partial(_blstm_step_kernel, hdp=hdp,
                               split_dirs=(hdp >= 128))

    out_p = pl.pallas_call(
        kernel,
        out_shape=jax.ShapeDtypeStruct((T, Bp, 2 * hdp), jnp.float32),
        grid_spec=pltpu.PrefetchScalarGridSpec(
            num_scalar_prefetch=0,
            grid=(nb, T),                       # b-tiles outer, time inner
            in_specs=[
                # forward gates: columns [0:4*hdp] at time t
                pl.BlockSpec((None, tb, 4 * hdp), lambda b, t: (t, b, 0)),
                # reverse gates: columns [4*hdp:8*hdp] at time T-1-t
                # (time flip folded into the index_map -> no wrapper flip pass)
                pl.BlockSpec((None, tb, 4 * hdp), lambda b, t: (T - 1 - t, b, 1)),
                # recurrent weights: full extent, resident across the grid
                pl.BlockSpec((2 * hdp, 8 * hdp), lambda b, t: (0, 0)),
            ],
            out_specs=pl.BlockSpec((None, tb, 2 * hdp), lambda b, t: (t, b, 0)),
            scratch_shapes=[pltpu.VMEM((tb, 2 * hdp), jnp.float32),   # h carry
                            pltpu.VMEM((tb, 2 * hdp), jnp.float32)],  # c carry
        ),
        compiler_params=pltpu.CompilerParams(
            dimension_semantics=("parallel", "arbitrary")),
    )(gx, gx, w_big)

    # Assemble PyTorch bidirectional layout.  Forward half is already at its
    # original time position; the reverse half was stored at step t = T-1-pos,
    # so un-flip it here, fused into the NCHW output permute we need anyway.
    out_f = out_p[:, :B, 0:hd]                     # (T, B, hd)
    out_r = out_p[::-1, :B, hdp:hdp + hd]          # (T, B, hd), original time
    out = jnp.concatenate([out_f, out_r], axis=-1)  # (W, N*H, 2*hd)
    out = out.reshape(W, N, H, 2 * hd)
    return jnp.transpose(out, (1, 3, 2, 0)).astype(x_nchw.dtype)  # (N, 2hd, H, W)


def _reference_blstm(x_nchw, params, hidden_size):
    """Pure-JAX reference (lax.scan, f32 HIGHEST) for correctness checking."""
    N, C, H, W = x_nchw.shape
    hp = jax.lax.Precision.HIGHEST
    hd = hidden_size
    x = jnp.transpose(x_nchw, (0, 2, 3, 1)).reshape(N * H, W, C).astype(jnp.float32)

    def run_dir(xs_tbc, w_ih, w_hh, b_ih, b_hh):
        def step(carry, x_t):
            h, c = carry
            g = (jnp.dot(x_t, w_ih.T, precision=hp)
                 + jnp.dot(h, w_hh.T, precision=hp) + b_ih + b_hh)
            i = jax.nn.sigmoid(g[:, :hd])
            f = jax.nn.sigmoid(g[:, hd:2 * hd])
            gg = jnp.tanh(g[:, 2 * hd:3 * hd])
            o = jax.nn.sigmoid(g[:, 3 * hd:])
            c = f * c + i * gg
            h = o * jnp.tanh(c)
            return (h, c), h

        Bz = xs_tbc.shape[1]
        init = (jnp.zeros((Bz, hd), jnp.float32), jnp.zeros((Bz, hd), jnp.float32))
        _, ys = jax.lax.scan(step, init, xs_tbc)
        return ys

    xs = jnp.transpose(x, (1, 0, 2))                        # (W, N*H, C)
    out_f = run_dir(xs, params["w_ih_f"], params["w_hh_f"],
                    params["b_ih_f"], params["b_hh_f"])
    out_r = run_dir(xs[::-1], params["w_ih_r"], params["w_hh_r"],
                    params["b_ih_r"], params["b_hh_r"])[::-1]
    out = jnp.concatenate([out_f, out_r], axis=-1)
    out = jnp.transpose(out, (1, 0, 2)).reshape(N, H, W, 2 * hd)
    return jnp.transpose(out, (0, 3, 1, 2))


if __name__ == "__main__":
    key = jax.random.PRNGKey(0)

    # Config 1: small shapes, hidden=32 padded to 64 -> fused block-diag matmul.
    # Config 2: CTPN-like hidden=128 (no pad) -> split per-direction matmuls.
    configs = [((2, 4, 8, 16), 32), ((1, 64, 8, 16), 128)]

    for (N, C, H, W), hidden in configs:
        k_x, k_p, key = jax.random.split(key, 3)
        x = jax.random.normal(k_x, (N, C, H, W), jnp.float32)
        params = init_blstm_params(k_p, C, hidden)

        out = jax.block_until_ready(blstm_forward(x, params, hidden_size=hidden))
        assert out.shape == (N, 2 * hidden, H, W), out.shape

        ref = jax.block_until_ready(_reference_blstm(x, params, hidden))
        # Kernel uses bf16 MXU operands (f32 accumulation) while the reference
        # runs f32 HIGHEST; expected drift over T=16 steps is a few 1e-3, so
        # the tolerance is relaxed accordingly (deliberate, per perf review).
        np.testing.assert_allclose(np.asarray(out), np.asarray(ref),
                                   rtol=3e-2, atol=3e-2)

    print("KERNEL_OK")
</pallas_src>

<mosaic_0001>
module attributes {stable_mosaic.version = 11 : i64} {
  func.func @_blstm_step_kernel(%arg0: i32, %arg1: i32, %arg2: memref<1x16x256xbf16, #tpu.memory_space<vmem>>, %arg3: memref<1x16x256xbf16, #tpu.memory_space<vmem>>, %arg4: memref<128x512xbf16, #tpu.memory_space<vmem>>, %arg5: memref<1x16x128xf32, #tpu.memory_space<vmem>>, %arg6: memref<16x128xf32, #tpu.memory_space<vmem>>, %arg7: memref<16x128xf32, #tpu.memory_space<vmem>>) attributes {dimension_semantics = [#tpu.dimension_semantics<parallel>, #tpu.dimension_semantics<arbitrary>], iteration_bounds = array<i64: 1, 16>, scalar_prefetch = 0 : i64, scratch_operands = 2 : i64, tpu.core_type = #tpu.core_type<tc>, window_params = [{transform_indices = @transform_0, window_bounds = array<i64: 1, 16, 256>}, {transform_indices = @transform_1, window_bounds = array<i64: 1, 16, 256>}, {pipeline_mode = #tpu.pipeline_mode<synchronous>, transform_indices = @transform_2, window_bounds = array<i64: 128, 512>}, {transform_indices = @transform_3, window_bounds = array<i64: 1, 16, 128>}]} {
    %c0_i32 = arith.constant 0 : i32
    %0 = arith.cmpi eq, %arg1, %c0_i32 : i32
    %1 = arith.extui %0 : i1 to i32
    %c0_i32_0 = arith.constant 0 : i32
    %2 = arith.cmpi ne, %1, %c0_i32_0 : i32
    scf.if %2 {
      %cst_25 = arith.constant 0.000000e+00 : f32
      %77 = vector.broadcast %cst_25 : f32 to vector<16x128xf32>
      %c0_26 = arith.constant 0 : index
      %c0_27 = arith.constant 0 : index
      %78 = vector.load %arg6[%c0_26, %c0_27] : memref<16x128xf32, #tpu.memory_space<vmem>>, vector<16x128xf32>
      tpu.vector_store %arg6[%c0_26, %c0_27], %77 {strides = array<i32>} : memref<16x128xf32, #tpu.memory_space<vmem>>, vector<16x128xf32>,
      %cst_28 = arith.constant 0.000000e+00 : f32
      %79 = vector.broadcast %cst_28 : f32 to vector<16x128xf32>
      %c0_29 = arith.constant 0 : index
      %c0_30 = arith.constant 0 : index
      %80 = vector.load %arg7[%c0_29, %c0_30] : memref<16x128xf32, #tpu.memory_space<vmem>>, vector<16x128xf32>
      tpu.vector_store %arg7[%c0_29, %c0_30], %79 {strides = array<i32>} : memref<16x128xf32, #tpu.memory_space<vmem>>, vector<16x128xf32>,
    } else {
    }
    %c0 = arith.constant 0 : index
    %c0_1 = arith.constant 0 : index
    %3 = vector.load %arg6[%c0, %c0_1] : memref<16x128xf32, #tpu.memory_space<vmem>>, vector<16x128xf32>
    %4 = arith.truncf %3 : vector<16x128xf32> to vector<16x128xbf16>
    %c0_2 = arith.constant 0 : index
    %c0_3 = arith.constant 0 : index
    %5 = vector.load %arg4[%c0_2, %c0_3] : memref<128x512xbf16, #tpu.memory_space<vmem>>, vector<128x512xbf16>
    %cst = arith.constant dense<0.000000e+00> : vector<16x512xf32>
    %6 = tpu.matmul %4, %5, %cst {dimension_numbers = #tpu.dot_dimension_numbers<[1], [0], [0], [1], [0, 0, 1, 1], [], []>} : vector<16x128xbf16>, vector<128x512xbf16>, vector<16x512xf32> -> vector<16x512xf32>
    %7 = vector.extract_strided_slice %6 {offsets = [0, 0], sizes = [16, 256], strides = [1, 1]} : vector<16x512xf32> to vector<16x256xf32>
    %8 = vector.extract_strided_slice %6 {offsets = [0, 256], sizes = [16, 256], strides = [1, 1]} : vector<16x512xf32> to vector<16x256xf32>
    %c0_4 = arith.constant 0 : index
    %c0_5 = arith.constant 0 : index
    %c0_6 = arith.constant 0 : index
    %9 = vector.load %arg2[%c0_4, %c0_5, %c0_6] : memref<1x16x256xbf16, #tpu.memory_space<vmem>>, vector<1x16x256xbf16>
    %10 = vector.shape_cast %9 : vector<1x16x256xbf16> to vector<16x256xbf16>
    %11 = arith.extf %10 : vector<16x256xbf16> to vector<16x256xf32>
    %12 = arith.addf %11, %7 : vector<16x256xf32>
    %c0_7 = arith.constant 0 : index
    %c0_8 = arith.constant 0 : index
    %c0_9 = arith.constant 0 : index
    %13 = vector.load %arg3[%c0_7, %c0_8, %c0_9] : memref<1x16x256xbf16, #tpu.memory_space<vmem>>, vector<1x16x256xbf16>
    %14 = vector.shape_cast %13 : vector<1x16x256xbf16> to vector<16x256xbf16>
    %15 = arith.extf %14 : vector<16x256xbf16> to vector<16x256xf32>
    %16 = arith.addf %15, %8 : vector<16x256xf32>
    %c0_10 = arith.constant 0 : index
    %c0_11 = arith.constant 0 : index
    %17 = vector.load %arg7[%c0_10, %c0_11] : memref<16x128xf32, #tpu.memory_space<vmem>>, vector<16x128xf32>
    %18 = vector.extract_strided_slice %17 {offsets = [0, 0], sizes = [16, 64], strides = [1, 1]} : vector<16x128xf32> to vector<16x64xf32>
    %19 = vector.extract_strided_slice %12 {offsets = [0, 0], sizes = [16, 64], strides = [1, 1]} : vector<16x256xf32> to vector<16x64xf32>
    %20 = arith.negf %19 : vector<16x64xf32>
    %21 = math.exp %20 : vector<16x64xf32>
    %cst_12 = arith.constant 1.000000e+00 : f32
    %22 = vector.broadcast %cst_12 : f32 to vector<16x64xf32>
    %23 = arith.addf %22, %21 : vector<16x64xf32>
    %24 = arith.divf %22, %23 : vector<16x64xf32>
    %25 = vector.extract_strided_slice %12 {offsets = [0, 64], sizes = [16, 64], strides = [1, 1]} : vector<16x256xf32> to vector<16x64xf32>
    %26 = arith.negf %25 : vector<16x64xf32>
    %27 = math.exp %26 : vector<16x64xf32>
    %cst_13 = arith.constant 1.000000e+00 : f32
    %28 = vector.broadcast %cst_13 : f32 to vector<16x64xf32>
    %29 = arith.addf %28, %27 : vector<16x64xf32>
    %30 = arith.divf %28, %29 : vector<16x64xf32>
    %31 = vector.extract_strided_slice %12 {offsets = [0, 128], sizes = [16, 64], strides = [1, 1]} : vector<16x256xf32> to vector<16x64xf32>
    %32 = arith.negf %31 : vector<16x64xf32>
    %33 = math.exp %32 : vector<16x64xf32>
    %cst_14 = arith.constant 1.000000e+00 : f32
    %34 = vector.broadcast %cst_14 : f32 to vector<16x64xf32>
    %35 = arith.addf %34, %33 : vector<16x64xf32>
    %36 = arith.divf %34, %35 : vector<16x64xf32>
    %37 = vector.extract_strided_slice %12 {offsets = [0, 192], sizes = [16, 64], strides = [1, 1]} : vector<16x256xf32> to vector<16x64xf32>
    %38 = math.tanh %37 : vector<16x64xf32>
    %39 = arith.mulf %30, %18 : vector<16x64xf32>
    %40 = arith.mulf %24, %38 : vector<16x64xf32>
    %41 = arith.addf %39, %40 : vector<16x64xf32>
    %42 = math.tanh %41 : vector<16x64xf32>
    %43 = arith.mulf %36, %42 : vector<16x64xf32>
    %44 = vector.extract_strided_slice %17 {offsets = [0, 64], sizes = [16, 64], strides = [1, 1]} : vector<16x128xf32> to vector<16x64xf32>
    %45 = vector.extract_strided_slice %16 {offsets = [0, 0], sizes = [16, 64], strides = [1, 1]} : vector<16x256xf32> to vector<16x64xf32>
    %46 = arith.negf %45 : vector<16x64xf32>
    %47 = math.exp %46 : vector<16x64xf32>
    %cst_15 = arith.constant 1.000000e+00 : f32
    %48 = vector.broadcast %cst_15 : f32 to vector<16x64xf32>
    %49 = arith.addf %48, %47 : vector<16x64xf32>
    %50 = arith.divf %48, %49 : vector<16x64xf32>
    %51 = vector.extract_strided_slice %16 {offsets = [0, 64], sizes = [16, 64], strides = [1, 1]} : vector<16x256xf32> to vector<16x64xf32>
    %52 = arith.negf %51 : vector<16x64xf32>
    %53 = math.exp %52 : vector<16x64xf32>
    %cst_16 = arith.constant 1.000000e+00 : f32
    %54 = vector.broadcast %cst_16 : f32 to vector<16x64xf32>
    %55 = arith.addf %54, %53 : vector<16x64xf32>
    %56 = arith.divf %54, %55 : vector<16x64xf32>
    %57 = vector.extract_strided_slice %16 {offsets = [0, 128], sizes = [16, 64], strides = [1, 1]} : vector<16x256xf32> to vector<16x64xf32>
    %58 = arith.negf %57 : vector<16x64xf32>
    %59 = math.exp %58 : vector<16x64xf32>
    %cst_17 = arith.constant 1.000000e+00 : f32
    %60 = vector.broadcast %cst_17 : f32 to vector<16x64xf32>
    %61 = arith.addf %60, %59 : vector<16x64xf32>
    %62 = arith.divf %60, %61 : vector<16x64xf32>
    %63 = vector.extract_strided_slice %16 {offsets = [0, 192], sizes = [16, 64], strides = [1, 1]} : vector<16x256xf32> to vector<16x64xf32>
    %64 = math.tanh %63 : vector<16x64xf32>
    %65 = arith.mulf %56, %44 : vector<16x64xf32>
    %66 = arith.mulf %50, %64 : vector<16x64xf32>
    %67 = arith.addf %65, %66 : vector<16x64xf32>
    %68 = math.tanh %67 : vector<16x64xf32>
    %69 = arith.mulf %62, %68 : vector<16x64xf32>
    %70 = tpu.concatenate %43, %69 in 1 : vector<16x64xf32>, vector<16x64xf32> -> vector<16x128xf32>
    %c0_18 = arith.constant 0 : index
    %c0_19 = arith.constant 0 : index
    %71 = vector.load %arg6[%c0_18, %c0_19] : memref<16x128xf32, #tpu.memory_space<vmem>>, vector<16x128xf32>
    tpu.vector_store %arg6[%c0_18, %c0_19], %70 {strides = array<i32>} : memref<16x128xf32, #tpu.memory_space<vmem>>, vector<16x128xf32>,
    %72 = tpu.concatenate %41, %67 in 1 : vector<16x64xf32>, vector<16x64xf32> -> vector<16x128xf32>
    %c0_20 = arith.constant 0 : index
    %c0_21 = arith.constant 0 : index
    %73 = vector.load %arg7[%c0_20, %c0_21] : memref<16x128xf32, #tpu.memory_space<vmem>>, vector<16x128xf32>
    tpu.vector_store %arg7[%c0_20, %c0_21], %72 {strides = array<i32>} : memref<16x128xf32, #tpu.memory_space<vmem>>, vector<16x128xf32>,
    %c0_22 = arith.constant 0 : index
    %c0_23 = arith.constant 0 : index
    %c0_24 = arith.constant 0 : index
    %74 = vector.load %arg5[%c0_22, %c0_23, %c0_24] : memref<1x16x128xf32, #tpu.memory_space<vmem>>, vector<1x16x128xf32>
    %75 = vector.shape_cast %74 : vector<1x16x128xf32> to vector<16x128xf32>
    %76 = vector.shape_cast %70 : vector<16x128xf32> to vector<1x16x128xf32>
    tpu.vector_store %arg5[%c0_22, %c0_23, %c0_24], %76 {strides = array<i32>} : memref<1x16x128xf32, #tpu.memory_space<vmem>>, vector<1x16x128xf32>,
    return
  }
  func.func @transform_0(%arg0: i32, %arg1: i32) -> (i32, i32, i32) {
    %c0_i32 = arith.constant 0 : i32
    %c0_i32_0 = arith.constant 0 : i32
    return %arg1, %arg0, %c0_i32 : i32, i32, i32
  }
  func.func @transform_1(%arg0: i32, %arg1: i32) -> (i32, i32, i32) {
    %c15_i32 = arith.constant 15 : i32
    %0 = arith.subi %c15_i32, %arg1 : i32
    %c1_i32 = arith.constant 1 : i32
    %c0_i32 = arith.constant 0 : i32
    return %0, %arg0, %c1_i32 : i32, i32, i32
  }
  func.func @transform_2(%arg0: i32, %arg1: i32) -> (i32, i32) {
    %c0_i32 = arith.constant 0 : i32
    %c0_i32_0 = arith.constant 0 : i32
    %c0_i32_1 = arith.constant 0 : i32
    return %c0_i32, %c0_i32_0 : i32, i32
  }
  func.func @transform_3(%arg0: i32, %arg1: i32) -> (i32, i32, i32) {
    %c0_i32 = arith.constant 0 : i32
    %c0_i32_0 = arith.constant 0 : i32
    return %arg1, %arg0, %c0_i32 : i32, i32, i32
  }
}

</mosaic_0001>

<bundles_post_ra>
// kernel: blstm_forward.1
= control target key start
LH: loop header
LB: loop body
LE: loop exit
PB: predicated region body
PF: predicated region fallthrough
CT: control target
= control target key end

     0   :  { %s1338_s12 = smov 0   ;;  %s1340_s13 = smov 0   ;;  %s1715_s0 = inlined_call_operand.vmem [shape: bf16[16,16,512], index: 0, kind: input, shape index: {}, may-alias: {0,1}]   ;;  %s1716_s1 = inlined_call_operand.vmem [shape: bf16[16,16,512], index: 1, kind: input, shape index: {}, may-alias: {0,1}]   ;;  %s1717_s2 = inlined_call_operand.vmem [shape: bf16[128,512], index: 2, kind: input, shape index: {}]   ;;  %s1718_s3 = inlined_call_operand.vmem [shape: f32[16,16,128], index: 3, kind: output, shape index: {}]  }
   0x1   :  { %s1342_s14 = smov 0   ;;  %s1344_s15 = smov 0  }
   0x2   :  { %s1346_s16 = smov 0   ;;  %s1348_s17 = smov 0  }
   0x3   :  { %s1350_s18 = smov 0  }
   0x4 LB: > { %s22_s19 = sadd.s32 1, %s1310_s17  ;;  %s34_s20 = sadd.s32 1, %s1302_s15  ;;  %s1314_s18 = sphi %s1350_s18, %s13_s18   ;;  %s1310_s17 = sphi %s1348_s17, %s1725_s17   ;;  %s1306_s16 = sphi %s1346_s16, %s1724_s16   ;;  %s1302_s15 = sphi %s1344_s15, %s1723_s15   ;;  %s1298_s14 = sphi %s1342_s14, %s1722_s14   ;;  %s1294_s13 = sphi %s1340_s13, %s1721_s13   ;;  %s1290_s12 = sphi %s1338_s12, %s1720_s12  }
   0x5   : > { %p23_p0 = scmp.ge.s32.totalorder %s22_s19, 16  ;;  %p41_p1 = scmp.ne.s32.totalorder %s1302_s15, %s1298_s14 }
   0x6   : > { %p42_p2 = scmp.eq.s32.totalorder %s1314_s18, 0  ;;  %s57_s21 = ssub.s32 15, %s1310_s17 }
   0x7   : > { %s1727_s19 = smov (%p23_p0, %s22_s19), 0  ;;  %s64_s22 = sadd.s32 1, %s1294_s13 }
   0x8   : > { %p43_p3 = por %p42_p2, %p41_p1  ;;  %s29_s23 = ssub.s32 %s1310_s17, %s1727_s19 }
   0x9   : > { %s58_s24 = ssub.s32 15, %s1727_s19  ;;  %p32_p4 = scmp.eq.s32.totalorder %s29_s23, 0 }
   0xa   : > { %s59_s25 = ssub.s32 %s57_s21, %s58_s24  ;;  %p71_p6 = scmp.ne.s32.totalorder %s1294_s13, %s1290_s12 }
   0xb   : > { %p62_p5 = scmp.eq.s32.totalorder %s59_s25, 0  ;;  %p966_p8 = scmp.ge.s32.totalorder %s1314_s18, 16 }
   0xc   : > { %s1390_s26 = scalar_select %p32_p4, %s1302_s15, %s34_s20  }
   0xd   : > { %s1393_s27 = scalar_select %p62_p5, %s1294_s13, %s64_s22  }
   0xe   : > { %p1397_p7 = por %p71_p6, %p42_p2  ;;  %149 = sbr.rel (%p966_p8) target bundleno = 31 (0x1f), region = 20 }
  0x13   : > { %152 = sbr.rel (!%p43_p3) target bundleno = 25 (0x19), region = 24  ;;  %s154_s29 = sand.u32 (%p43_p3), 1, %s1302_s15  }
  0x14   : > { %s1119_s30 = sshll.u32 (%p43_p3), %s1310_s17, 5  ;;  %s967_s4 = sshll.u32 (%p43_p3), %s154_s29, 4 }
  0x15   : > { %s162_s7 = scalar_lea.vmem (%p43_p3), %s1715_s0, %s1119_s30  ;;  %s156_s8 = scalar_lea.vmem (%p43_p3), [#allocation4], %s967_s4 }
  0x16   : > { %v193_v0 = vld [vmem:[%s162_s7] sm:$0xff] (%p43_p3)  ;;  %v195_v1 = vld [vmem:[%s162_s7 + $0x10] sm:$0xff] (%p43_p3) }
  0x17   : > { %194 = vst [vmem:[%s156_s8] sm:$0xff] (%p43_p3), %v193_v0 }
  0x18   : > { %196 = vst [vmem:[%s156_s8 + $0x8] sm:$0xff] %v195_v1 }
  0x19 PF: > { %202 = sbr.rel (!%p1397_p7) target bundleno = 31 (0x1f), region = 62  ;;  %s204_s9 = sand.u32 (%p1397_p7), 1, %s1294_s13  }
  0x1a   : > { %s1120_s10 = sshll.u32 (%p1397_p7), %s57_s21, 5  ;;  %s970_s11 = sshll.u32 (%p1397_p7), %s204_s9, 4 }
  0x1b   : > { %s894_s23 = scalar_lea.vmem (%p1397_p7), %s1716_s1, %s1120_s10  ;;  %s206_s24 = scalar_lea.vmem (%p1397_p7), [#allocation5], %s970_s11 }
  0x1c   : > { %v973_v2 = vld [vmem:[%s894_s23 + $0x8] sm:$0xff] (%p1397_p7)  ;;  %v974_v3 = vld [vmem:[%s894_s23 + $0x18] sm:$0xff] (%p1397_p7) }
  0x1d   : > { %246 = vst [vmem:[%s206_s24] sm:$0xff] (%p1397_p7), %v973_v2 }
  0x1e   : > { %248 = vst [vmem:[%s206_s24 + $0x8] sm:$0xff] %v974_v3 }
  0x1f PF: > { %p975_p9 = scmp.ge.s32.totalorder %s1314_s18, 1  ;;  %p253_p10 = scmp.lt.s32.totalorder %s1314_s18, 17 }
  0x21   : > { %p254_p11 = pnand %p975_p9, %p253_p10 }
  0x22   : > { %s260_s21 = sand.u32 (!%p254_p11), 1, %s1298_s14   ;;  %s267_s25 = sand.u32 (!%p254_p11), 1, %s1290_s12  }
  0x23   : > { %257 = sbr.rel (%p254_p11) target bundleno = 664 (0x298), region = 100  ;;  %s1417_s28 = sshll.u32 (!%p254_p11), %s260_s21, 4 }
  0x24   : > { %s1419_s29 = sshll.u32 (!%p254_p11), %s267_s25, 4  ;;  %p302_p12 = scmp.lt.s32.totalorder (!%p254_p11), %s1306_s16, 15 }
  0x25   : > { %s262_s8 = scalar_lea.vmem (!%p254_p11), [#allocation4], %s1417_s28  ;;  %s269_s9 = scalar_lea.vmem (!%p254_p11), [#allocation5], %s1419_s29 }
  0x26   : > { %p980_p13 = scmp.ne.s32.totalorder (!%p254_p11), %s1306_s16, 0 }
  0x28   : > { %s303_s30 = scalar_select %p302_p12, %s1306_s16, 15 }
  0x29   : > { %314 = sbr.rel (%p980_p13) target bundleno = 51 (0x33), region = 112 }
  0x2a   : > { %s1121_s4 = sshll.u32 %s303_s30, 4 }
  0x2b   : > { %s1426_s7 = scalar_lea.vmem %s1718_s3, %s1121_s4 }
  0x2e   : > { %v1316_v4 = vmov 0.0  }
  0x2f   : > { %315 = vst [vmem:[#allocation2] sm:$0xff] %v1316_v4 }
  0x30   : > { %316 = vst [vmem:[#allocation2 + $0x8] sm:$0xff] %v1316_v4 }
  0x31   : > { %317 = vst [vmem:[#allocation3 + $0x8] sm:$0xff] %v1316_v4 }
  0x32   : > { %318 = vst [vmem:[#allocation3] sm:$0xff] %v1316_v4 }
  0x33 PF: > { %v1150_v5 = vld [vmem:[%s1717_s2 + $0xe4] sm:$0xf]  ;;  %v1097_v6 = vld [vmem:[%s1717_s2 + $0xf0] sm:$0xf0]  ;;  %v1151_v7 = vld [vmem:[%s1717_s2 + $0xec] sm:$0xf] }
  0x34   : > { %v1100_v8 = vor.u32 %v1150_v5, %v1097_v6  ;;  %v1105_v9 = vld [vmem:[%s1717_s2 + $0xf8] sm:$0xf0]  ;;  %v1146_v10 = vld [vmem:[%s1717_s2 + $0xc4] sm:$0xf]  ;;  %v1081_v11 = vld [vmem:[%s1717_s2 + $0xd0] sm:$0xf0] }
  0x35   : > { %v1108_v12 = vor.u32 %v1151_v7, %v1105_v9  ;;  %v1147_v13 = vld [vmem:[%s1717_s2 + $0xcc] sm:$0xf]  ;;  %v1089_v14 = vld [vmem:[%s1717_s2 + $0xd8] sm:$0xf0]  ;;  %v1084_v15 = vor.u32 %v1146_v10, %v1081_v11  ;;  %v1142_v17 = vld [vmem:[%s1717_s2 + $0xa4] sm:$0xf] }
  0x36   : > { %528 = vmatpush.bf16.msra.mxu1 %v1100_v8  ;;  %v1092_v16 = vor.u32 %v1147_v13, %v1089_v14  ;;  %v1065_v18 = vld [vmem:[%s1717_s2 + $0xb0] sm:$0xf0]  ;;  %v1143_v19 = vld [vmem:[%s1717_s2 + $0xac] sm:$0xf]  ;;  %v1073_v20 = vld [vmem:[%s1717_s2 + $0xb8] sm:$0xf0] }
  0x37   : > { %556 = vmatpush.bf16.msra.mxu3 %v1108_v12  ;;  %v1068_v21 = vor.u32 %v1142_v17, %v1065_v18  ;;  %v1076_v22 = vor.u32 %v1143_v19, %v1073_v20  ;;  %v1138_v23 = vld [vmem:[%s1717_s2 + $0x84] sm:$0xf]  ;;  %v1049_v24 = vld [vmem:[%s1717_s2 + $0x90] sm:$0xf0]  ;;  %v1139_v25 = vld [vmem:[%s1717_s2 + $0x8c] sm:$0xf] }
  0x38   : > { %v1057_v26 = vld [vmem:[%s1717_s2 + $0x98] sm:$0xf0]  ;;  %v1052_v27 = vor.u32 %v1138_v23, %v1049_v24  ;;  %v1134_v28 = vld [vmem:[%s1717_s2 + $0x64] sm:$0xf]  ;;  %v1103_v29 = vld [vmem:[%s1717_s2 + $0xe8] sm:$0xf] }
  0x39   : > { %v1153_v30 = vld [vmem:[%s1717_s2 + $0xf4] sm:$0xf0]  ;;  %v1060_v31 = vor.u32 %v1139_v25, %v1057_v26  ;;  %v1033_v32 = vld [vmem:[%s1717_s2 + $0x70] sm:$0xf0]  ;;  %v1087_v34 = vld [vmem:[%s1717_s2 + $0xc8] sm:$0xf] }
  0x3a   : > { %529 = vmatpush.bf16.msra.mxu1 %v1084_v15  ;;  %v1104_v33 = vor.u32 %v1153_v30, %v1103_v29  ;;  %v1149_v35 = vld [vmem:[%s1717_s2 + $0xd4] sm:$0xf0]  ;;  %v1135_v36 = vld [vmem:[%s1717_s2 + $0x6c] sm:$0xf]  ;;  %v1041_v37 = vld [vmem:[%s1717_s2 + $0x78] sm:$0xf0]  ;;  %v1036_v40 = vor.u32 %v1134_v28, %v1033_v32 }
  0x3b   : > { %557 = vmatpush.bf16.msra.mxu3 %v1092_v16  ;;  %v1088_v38 = vor.u32 %v1149_v35, %v1087_v34  ;;  %v1071_v39 = vld [vmem:[%s1717_s2 + $0xa8] sm:$0xf]  ;;  %v1145_v41 = vld [vmem:[%s1717_s2 + $0xb4] sm:$0xf0]  ;;  %v1095_v42 = vld [vmem:[%s1717_s2 + $0xe0] sm:$0xf]  ;;  %v1044_v44 = vor.u32 %v1135_v36, %v1041_v37 }
  0x3c   : > { %542 = vmatpush.bf16.msra.mxu2 %v1104_v33  ;;  %v1152_v43 = vld [vmem:[%s1717_s2 + $0xec] sm:$0xf0]  ;;  %v1130_v45 = vld [vmem:[%s1717_s2 + $0x44] sm:$0xf]  ;;  %v1017_v46 = vld [vmem:[%s1717_s2 + $0x50] sm:$0xf0]  ;;  %v1072_v52 = vor.u32 %v1145_v41, %v1071_v39 }
  0x3d   : > { %v1096_v47 = vor.u32 %v1152_v43, %v1095_v42  ;;  %v1079_v48 = vld [vmem:[%s1717_s2 + $0xc0] sm:$0xf]  ;;  %v1131_v49 = vld [vmem:[%s1717_s2 + $0x4c] sm:$0xf]  ;;  %v1025_v50 = vld [vmem:[%s1717_s2 + $0x58] sm:$0xf0]  ;;  %v1020_v55 = vor.u32 %v1130_v45, %v1017_v46 }
  0x3e   : > { %530 = vmatpush.bf16.msra.mxu1 %v1068_v21  ;;  %v1148_v51 = vld [vmem:[%s1717_s2 + $0xcc] sm:$0xf0]  ;;  %v1055_v53 = vld [vmem:[%s1717_s2 + $0x88] sm:$0xf]  ;;  %v1141_v56 = vld [vmem:[%s1717_s2 + $0x94] sm:$0xf0]  ;;  %v1028_v59 = vor.u32 %v1131_v49, %v1025_v50 }
  0x3f   : > { %558 = vmatpush.bf16.msra.mxu3 %v1076_v22  ;;  %514 = vmatpush.bf16.msra.mxu0 %v1096_v47  ;;  %v1080_v54 = vor.u32 %v1148_v51, %v1079_v48  ;;  %v1063_v57 = vld [vmem:[%s1717_s2 + $0xa0] sm:$0xf]  ;;  %v1144_v58 = vld [vmem:[%s1717_s2 + $0xac] sm:$0xf0]  ;;  %v1126_v60 = vld [vmem:[%s1717_s2 + $0x24] sm:$0xf]  ;;  %v1056_v0 = vor.u32 %v1141_v56, %v1055_v53 }
  0x40   : > { %543 = vmatpush.bf16.msra.mxu2 %v1088_v38  ;;  %v1001_v61 = vld [vmem:[%s1717_s2 + $0x30] sm:$0xf0]  ;;  %v1127_v62 = vld [vmem:[%s1717_s2 + $0x2c] sm:$0xf]  ;;  %v1009_v63 = vld [vmem:[%s1717_s2 + $0x38] sm:$0xf0]  ;;  %v1064_v2 = vor.u32 %v1144_v58, %v1063_v57 }
  0x41   : > { %v1039_v1 = vld [vmem:[%s1717_s2 + $0x68] sm:$0xf]  ;;  %v1004_v3 = vor.u32 %v1126_v60, %v1001_v61  ;;  %v1137_v4 = vld [vmem:[%s1717_s2 + $0x74] sm:$0xf0]  ;;  %v1047_v5 = vld [vmem:[%s1717_s2 + $0x80] sm:$0xf]  ;;  %v1012_v7 = vor.u32 %v1127_v62, %v1009_v63 }
  0x42   : > { %531 = vmatpush.bf16.msra.mxu1 %v1052_v27  ;;  %v1140_v6 = vld [vmem:[%s1717_s2 + $0x8c] sm:$0xf0]  ;;  %v1122_v8 = vld [vmem:[%s1717_s2 + $0x4] sm:$0xf]  ;;  %v985_v9 = vld [vmem:[%s1717_s2 + $0x10] sm:$0xf0]  ;;  %v1040_v13 = vor.u32 %v1137_v4, %v1039_v1 }
  0x43   : > { %559 = vmatpush.bf16.msra.mxu3 %v1060_v31  ;;  %515 = vmatpush.bf16.msra.mxu0 %v1080_v54  ;;  %v1123_v10 = vld [vmem:[%s1717_s2 + $0xc] sm:$0xf]  ;;  %v993_v11 = vld [vmem:[%s1717_s2 + $0x18] sm:$0xf0]  ;;  %v319_v12 = vld [vmem:[#allocation2] sm:$0xff]  ;;  %v1048_v14 = vor.u32 %v1140_v6, %v1047_v5  ;;  %v988_v15 = vor.u32 %v1122_v8, %v985_v9  ;;  %s1317_s24 = smov 64  }
  0x44   : > { %544 = vmatpush.bf16.msra.mxu2 %v1072_v52  ;;  %v320_v16 = vld [vmem:[#allocation2 + $0x8] sm:$0xff]  ;;  %v1133_v18 = vld [vmem:[%s1717_s2 + $0x54] sm:$0xf0]  ;;  %v996_v19 = vor.u32 %v1123_v10, %v993_v11  ;;  %v1031_v20 = vld [vmem:[%s1717_s2 + $0x60] sm:$0xf] }
  0x45   : > { %v1023_v17 = vld [vmem:[%s1717_s2 + $0x48] sm:$0xf]  ;;  %v1136_v21 = vld [vmem:[%s1717_s2 + $0x6c] sm:$0xf0]  ;;  %v321_v22 = vpack.c.bf16 %v320_v16, %v319_v12  ;;  %v1129_v25 = vld [vmem:[%s1717_s2 + $0x34] sm:$0xf0] }
  0x46   : > { %532 = vmatpush.bf16.msra.mxu1 %v1036_v40  ;;  %v1024_v23 = vor.u32 %v1133_v18, %v1023_v17  ;;  %v1007_v24 = vld [vmem:[%s1717_s2 + $0x28] sm:$0xf]  ;;  %v1032_v26 = vor.u32 %v1136_v21, %v1031_v20  ;;  %v1015_v27 = vld [vmem:[%s1717_s2 + $0x40] sm:$0xf]  ;;  %v1132_v28 = vld [vmem:[%s1717_s2 + $0x4c] sm:$0xf0] }
  0x47   : > { %560 = vmatpush.bf16.msra.mxu3 %v1044_v44  ;;  %516 = vmatpush.bf16.msra.mxu0 %v1064_v2  ;;  %v1008_v29 = vor.u32 %v1129_v25, %v1007_v24  ;;  %v991_v30 = vld [vmem:[%s1717_s2 + $0x8] sm:$0xf]  ;;  %v1125_v31 = vld [vmem:[%s1717_s2 + $0x14] sm:$0xf0]  ;;  %v1016_v32 = vor.u32 %v1132_v28, %v1015_v27  ;;  %v999_v33 = vld [vmem:[%s1717_s2 + $0x20] sm:$0xf] }
  0x48   : > { %545 = vmatpush.bf16.msra.mxu2 %v1056_v0  ;;  %v1128_v34 = vld [vmem:[%s1717_s2 + $0x2c] sm:$0xf0]  ;;  %v992_v35 = vor.u32 %v1125_v31, %v991_v30  ;;  %v983_v37 = vld [vmem:[%s1717_s2] sm:$0xf]  ;;  %v571_v45 = vld [vmem:[%s262_s8 + $0x8] sm:$0xff] }
  0x49   : > { %v1000_v36 = vor.u32 %v1128_v34, %v999_v33  ;;  %v1124_v38 = vld [vmem:[%s1717_s2 + $0xc] sm:$0xf0]  ;;  %v575_v47 = vunpack.c.h.bf16 %v571_v45  ;;  %v581_v53 = vld [vmem:[%s269_s9 + $0x8] sm:$0xff]  ;;  %v574_v0 = vunpack.c.l.bf16 %v571_v45 }
  0x4a   : > { %533 = vmatpush.bf16.msra.mxu1 %v1020_v55  ;;  %v984_v39 = vor.u32 %v1124_v38, %v983_v37  ;;  %v570_v40 = vld [vmem:[%s262_s8] sm:$0xff]  ;;  %v585_v54 = vunpack.c.h.bf16 %v581_v53  ;;  %v1651_v61 = vld [vmem:[#allocation3 + $0x8] sm:$0xff] }
  0x4b   : > { %561 = vmatpush.bf16.msra.mxu3 %v1028_v59  ;;  %517 = vmatpush.bf16.msra.mxu0 %v1048_v14  ;;  %v573_v41 = vunpack.c.h.bf16 %v570_v40  ;;  %v580_v44 = vld [vmem:[%s269_s9] sm:$0xff]  ;;  %v572_v9 = vunpack.c.l.bf16 %v570_v40 }
  0x4c   : > { %546 = vmatpush.bf16.msra.mxu2 %v1040_v13  ;;  %v583_v46 = vunpack.c.h.bf16 %v580_v44  ;;  %v1646_v59 = vld [vmem:[#allocation3] sm:$0xff]  ;;  %v582_v1 = vunpack.c.l.bf16 %v580_v44 }
  0x4e   : > { %534 = vmatpush.bf16.msra.mxu1 %v1004_v3 }
  0x4f   : > { %562 = vmatpush.bf16.msra.mxu3 %v1012_v7  ;;  %518 = vmatpush.bf16.msra.mxu0 %v1032_v26  ;;  %v584_v7 = vunpack.c.l.bf16 %v581_v53 }
  0x50   : > { %547 = vmatpush.bf16.msra.mxu2 %v1024_v23 }
  0x52   : > { %535 = vmatpush.bf16.msra.mxu1 %v988_v15 }
  0x53   : > { %563 = vmatpush.bf16.msra.mxu3 %v996_v19  ;;  %519 = vmatpush.bf16.msra.mxu0 %v1016_v32 }
  0x54   : > { %548 = vmatpush.bf16.msra.mxu2 %v1008_v29 }
  0x55   : > { %536 = vmatmul.bf16.vlgmr.msra.gmra.mxu1 %v321_v22 }
  0x56   : > { %564 = vmatmul.bf16.vlgmr.msra.gmra.mxu3 %v321_v22 }
  0x57   : > { %520 = vmatpush.bf16.msra.mxu0 %v1000_v36 }
  0x58   : > { %549 = vmatpush.bf16.msra.mxu2 %v992_v35 }
  0x5b   : > { %550 = vmatmul.bf16.vlgmr.msra.gmra.mxu2 %v321_v22  ;;  %521 = vmatpush.bf16.msra.mxu0 %v984_v39 }
  0x5e   : > { %522 = vmatmul.bf16.vlgmr.msra.gmra.mxu0 %v321_v22 }
  0xd2   : > { %v537_v42 = vpop.f32.mrf.mxu1 }
  0xd3   : > { %v1625_v43 = vadd.f32 %v573_v41, %v537_v42 }
  0xd5   : > { %1212 = vtanh.f32 %v1625_v43 }
  0xd9   : > { %v565_v48 = vpop.f32.mrf.mxu3 }
  0xda   : > { %v1632_v49 = vadd.f32 %v583_v46, %v565_v48  ;;  %v539_v50 = vpop.f32.mrf.mxu1 }
  0xdb   : > { %v1213_v51 = vpop.eup %1212  ;;  %v1634_v52 = vadd.f32 %v575_v47, %v539_v50  ;;  %v523_v62 = vpop.f32.mrf.mxu0 }
  0xdc   : > { %1214 = vtanh.f32 %v1632_v49  ;;  %682 = vrot.lane.b32.xlu1 %v1213_v51, %s1317_s24  ;;  %v576_v11 = vadd.f32 %v572_v9, %v523_v62 }
  0xdd   : > { %1216 = vtanh.f32 %v1634_v52 }
  0xde   : > { %v551_v63 = vpop.f32.mrf.mxu2  ;;  %v1109_v15 = vmul.f32 -1.442695, %v576_v11 }
  0xdf   : > { %v586_v4 = vadd.f32 %v582_v1, %v551_v63 }
  0xe1   : > { %v567_v55 = vpop.f32.mrf.mxu3  ;;  %v1113_v6 = vmul.f32 -1.442695, %v586_v4 }
  0xe2   : > { %v1215_v56 = vpop.eup %1214  ;;  %v1641_v57 = vadd.f32 %v585_v54, %v567_v55 }
  0xe3   : > { %v1217_v58 = vpop.eup %1216  ;;  %794 = vrot.lane.b32.xlu0 %v1215_v56, %s1317_s24  ;;  %v525_v2 = vpop.f32.mrf.mxu0 }
  0xe4   : > { %1218 = vtanh.f32 %v1641_v57  ;;  %684 = vrot.lane.b32.xlu1 %v1217_v58, %s1317_s24  ;;  %v578_v3 = vadd.f32 %v574_v0, %v525_v2 }
  0xe6   : > { %v1110_v5 = vmul.f32 -1.442695, %v578_v3  ;;  %v553_v8 = vpop.f32.mrf.mxu2 }
  0xe7   : > { %v588_v10 = vadd.f32 %v584_v7, %v553_v8 }
  0xe8   : > { %1220 = vpow2.f32 %v1110_v5 }
  0xe9   : > { %1222 = vpow2.f32 %v1113_v6  ;;  %v1114_v12 = vmul.f32 -1.442695, %v588_v10 }
  0xea   : > { %v1219_v60 = vpop.eup %1218 }
  0xeb   : > { %796 = vrot.lane.b32.xlu0 %v1219_v60, %s1317_s24  ;;  %1224 = vpow2.f32 %v1114_v12 }
  0xec   : > { %674 = vrot.lane.b32.xlu1 %v1646_v59, %s1317_s24  ;;  %1226 = vpow2.f32 %v1109_v15 }
  0xee   : > { %v1221_v13 = vpop.eup %1220 }
  0xef   : > { %v1223_v14 = vpop.eup %1222  ;;  %v599_v16 = vadd.f32 1.0, %v1221_v13 }
  0xf0   : > { %v718_v17 = vadd.f32 1.0, %v1223_v14 }
  0xf1   : > { %1228 = vrcp.f32 %v599_v16  ;;  %v1225_v18 = vpop.eup %1224  ;;  %vm620_vm0 = vweird.f32 %v599_v16  ;;  %v626_v33 = vand.u32 2147483648, %v599_v16  ;;  %v624_v36 = vand.u32 2147483647, %v599_v16 }
  0xf2   : > { %1230 = vrcp.f32 %v718_v17  ;;  %v1227_v19 = vpop.eup %1226  ;;  %v719_v20 = vadd.f32 1.0, %v1225_v18  ;;  %vm725_vm2 = vweird.f32 %v718_v17  ;;  %v731_v34 = vand.u32 2147483648, %v718_v17 }
  0xf3   : > { %672 = vrot.lane.b32.xlu0 %v1651_v61, %s1317_s24  ;;  %v1655_v23 = vadd.f32 1.0, %v1227_v19  ;;  %v729_v40 = vand.u32 2147483647, %v718_v17  ;;  %v627_v42 = vor.u32 1.1754944e-38, %v626_v33  ;;  %vm625_vm6 = vcmp.eq.f32.partialorder %v624_v36, 8.507059e+37 }
  0xf4   : > { %1232 = vrcp.f32 %v719_v20  ;;  %v732_v44 = vor.u32 1.1754944e-38, %v731_v34  ;;  %vm740_vm8 = vweird.f32 %v719_v20  ;;  %v746_v54 = vand.u32 2147483648, %v719_v20 }
  0xf5   : > { %1234 = vrcp.f32 %v1655_v23  ;;  %vm730_vm7 = vcmp.eq.f32.partialorder %v729_v40, 8.507059e+37  ;;  %v744_v62 = vand.u32 2147483647, %v719_v20  ;;  %vm605_vm11 = vweird.f32 %v1655_v23 }
  0xf6   : > { %v611_v0 = vand.u32 2147483648, %v1655_v23  ;;  %v747_v1 = vor.u32 1.1754944e-38, %v746_v54  ;;  %v609_v3 = vand.u32 2147483647, %v1655_v23 }
  0xf7   : > { %v1229_v21 = vpop.eup %1228  ;;  %vm745_vm13 = vcmp.eq.f32.partialorder %v744_v62, 8.507059e+37 }
  0xf8   : > { %v1231_v22 = vpop.eup %1230  ;;  %v616_v24 = vmul.f32 %v1229_v21, %v599_v16  ;;  %vm621_vm1 = vweird.f32 %v1229_v21  ;;  %v612_v5 = vor.u32 1.1754944e-38, %v611_v0  ;;  %vm610_vm15 = vcmp.eq.f32.partialorder %v609_v3, 8.507059e+37 }
  0xf9   : > { %v721_v25 = vmul.f32 %v1231_v22, %v718_v17  ;;  %vm726_vm3 = vweird.f32 %v1231_v22  ;;  %vm622_vm4 = vmor %vm620_vm0, %vm621_vm1 }
  0xfa   : > { %v617_v26 = vsub.f32 1.0, %v616_v24  ;;  %v1233_v28 = vpop.eup %1232  ;;  %vm727_vm5 = vmor %vm725_vm2, %vm726_vm3 }
  0xfb   : > { %v722_v27 = vsub.f32 1.0, %v721_v25  ;;  %v736_v31 = vmul.f32 %v1233_v28, %v719_v20  ;;  %v1235_v32 = vpop.eup %1234  ;;  %vm741_vm9 = vweird.f32 %v1233_v28 }
  0xfc   : > { %v618_v29 = vmul.f32 %v1229_v21, %v617_v26  ;;  %v601_v38 = vmul.f32 %v1235_v32, %v1655_v23  ;;  %vm742_vm10 = vmor %vm740_vm8, %vm741_vm9  ;;  %vm606_vm12 = vweird.f32 %v1235_v32 }
  0xfd   : > { %v723_v30 = vmul.f32 %v1231_v22, %v722_v27  ;;  %v737_v41 = vsub.f32 1.0, %v736_v31  ;;  %vm607_vm14 = vmor %vm605_vm11, %vm606_vm12  ;;  %v1115_v31 = vmul.f32 -1.442695, %v1632_v49  ;;  %vm832_vm12 = vcmask 523264  }
  0xfe   : > { %v619_v35 = vadd.f32 %v1229_v21, %v618_v29  ;;  %v602_v46 = vsub.f32 1.0, %v601_v38 }
  0xff   : > { %v724_v39 = vadd.f32 %v1231_v22, %v723_v30  ;;  %v738_v48 = vmul.f32 %v1233_v28, %v737_v41  ;;  %v1112_v41 = vmul.f32 -1.442695, %v1634_v52 }
 0x100   : > { %v623_v45 = vsel %vm622_vm4, %v1229_v21, %v619_v35  ;;  %v603_v55 = vmul.f32 %v1235_v32, %v602_v46 }
 0x101   : > { %v728_v47 = vsel %vm727_vm5, %v1231_v22, %v724_v39  ;;  %v628_v50 = vsel %vm625_vm6, %v627_v42, %v623_v45  ;;  %v739_v60 = vadd.f32 %v1233_v28, %v738_v48 }
 0x102   : > { %v733_v53 = vsel %vm730_vm7, %v732_v44, %v728_v47  ;;  %v604_v2 = vadd.f32 %v1235_v32, %v603_v55 }
 0x103   : > { %v743_v4 = vsel %vm742_vm10, %v1233_v28, %v739_v60  ;;  %v790_v12 = vmul.f32 %v733_v53, %v1651_v61  ;;  %v1116_v28 = vmul.f32 -1.442695, %v1641_v57 }
 0x104   : > { %v748_v7 = vsel %vm745_vm13, %v747_v1, %v743_v4  ;;  %v608_v8 = vsel %vm607_vm14, %v1235_v32, %v604_v2 }
 0x105   : > { %v613_v10 = vsel %vm610_vm15, %v612_v5, %v608_v8  ;;  %v791_v15 = vmul.f32 %v748_v7, %v1646_v59 }
 0x14e   : > { %v683_v37 = vpop.permute.xlu1 %682 }
 0x14f   : > { %v688_v11 = vmul.f32 %v683_v37, %v613_v10 }
 0x155   : > { %v795_v51 = vpop.permute.xlu0 %794 }
 0x156   : > { %v800_v56 = vmul.f32 %v795_v51, %v733_v53  ;;  %v685_v58 = vpop.permute.xlu1 %684 }
 0x157   : > { %v689_v63 = vmul.f32 %v685_v58, %v628_v50 }
 0x158   : > { %804 = vrot.lane.b32.xlu2 %v800_v56, %s1317_s24 }
 0x159   : > { %694 = vrot.lane.b32.xlu0 %v689_v63, %s1317_s24 }
 0x15d   : > { %v797_v6 = vpop.permute.xlu0 %796 }
 0x15e   : > { %v801_v9 = vmul.f32 %v797_v6, %v748_v7  ;;  %v675_v23 = vpop.permute.xlu1 %674 }
 0x15f   : > { %v679_v24 = vmul.f32 %v675_v23, %v628_v50 }
 0x160   : > { %806 = vrot.lane.b32.xlu2 %v801_v9, %s1317_s24 }
 0x165   : > { %v673_v19 = vpop.permute.xlu0 %672 }
 0x166   : > { %v678_v20 = vmul.f32 %v673_v19, %v613_v10 }
 0x168   : > { %692 = vrot.lane.b32.xlu2 %v688_v11, %s1317_s24 }
 0x1b2   : > { %v805_v13 = vpop.permute.xlu2 %804 }
 0x1b3   : > { %v1667_v14 = vadd.f32 %v805_v13, %v790_v12 }
 0x1b5   : > { %1236 = vtanh.f32 %v1667_v14 }
 0x1ba   : > { %v807_v16 = vpop.permute.xlu2 %806 }
 0x1bb   : > { %v1237_v17 = vpop.eup %1236  ;;  %v1671_v18 = vadd.f32 %v807_v16, %v791_v15  ;;  %v1111_v15 = vmul.f32 -1.442695, %v1625_v43 }
 0x1bc   : > { %816 = vrot.lane.b32.xlu1 %v1237_v17, %s1317_s24 }
 0x1bd   : > { %1238 = vtanh.f32 %v1671_v18 }
 0x1c2   : > { %v693_v21 = vpop.permute.xlu2 %692 }
 0x1c3   : > { %v1239_v22 = vpop.eup %1238  ;;  %v698_v61 = vadd.f32 %v693_v21, %v678_v20 }
 0x1c4   : > { %818 = vrot.lane.b32.xlu2 %v1239_v22, %s1317_s24 }
 0x1c5   : > { %1240 = vtanh.f32 %v698_v61 }
 0x1cb   : > { %v1241_v25 = vpop.eup %1240  ;;  %v695_v59 = vpop.permute.xlu0 %694 }
 0x1cc   : > { %704 = vrot.lane.b32.xlu0 %v1241_v25, %s1317_s24  ;;  %v699_v26 = vadd.f32 %v695_v59, %v679_v24 }
 0x1ce   : > { %1242 = vtanh.f32 %v699_v26 }
 0x1cf   : > { %1244 = vpow2.f32 %v1116_v28 }
 0x1d4   : > { %v1243_v27 = vpop.eup %1242 }
 0x1d5   : > { %706 = vrot.lane.b32.xlu1 %v1243_v27, %s1317_s24  ;;  %v1245_v29 = vpop.eup %1244 }
 0x1d6   : > { %v757_v30 = vadd.f32 1.0, %v1245_v29 }
 0x1d8   : > { %1246 = vrcp.f32 %v757_v30  ;;  %v784_v40 = vand.u32 2147483648, %v757_v30  ;;  %vm778_vm1 = vweird.f32 %v757_v30  ;;  %v782_v57 = vand.u32 2147483647, %v757_v30 }
 0x1d9   : > { %1248 = vpow2.f32 %v1115_v31 }
 0x1da   : > { %v785_v44 = vor.u32 1.1754944e-38, %v784_v40  ;;  %vm783_vm3 = vcmp.eq.f32.partialorder %v782_v57, 8.507059e+37 }
 0x1dd   : > { %839 = vrot.lane.b32.xlu1 %v698_v61, %s1317_s24 }
 0x1de   : > { %v1247_v32 = vpop.eup %1246 }
 0x1df   : > { %v1249_v33 = vpop.eup %1248  ;;  %v774_v34 = vmul.f32 %v1247_v32, %v757_v30  ;;  %vm779_vm0 = vweird.f32 %v1247_v32 }
 0x1e0   : > { %v756_v35 = vadd.f32 1.0, %v1249_v33  ;;  %vm780_vm2 = vmor %vm778_vm1, %vm779_vm0 }
 0x1e1   : > { %v775_v36 = vsub.f32 1.0, %v774_v34 }
 0x1e2   : > { %1250 = vrcp.f32 %v756_v35  ;;  %v769_v55 = vand.u32 2147483648, %v756_v35  ;;  %vm763_vm5 = vweird.f32 %v756_v35  ;;  %v767_v52 = vand.u32 2147483647, %v756_v35 }
 0x1e3   : > { %v776_v37 = vmul.f32 %v1247_v32, %v775_v36  ;;  %1252 = vpow2.f32 %v1112_v41 }
 0x1e4   : > { %v770_v58 = vor.u32 1.1754944e-38, %v769_v55  ;;  %vm768_vm7 = vcmp.eq.f32.partialorder %v767_v52, 8.507059e+37 }
 0x1e5   : > { %v777_v38 = vadd.f32 %v1247_v32, %v776_v37 }
 0x1e7   : > { %v781_v42 = vsel %vm780_vm2, %v1247_v32, %v777_v38 }
 0x1e8   : > { %v1251_v39 = vpop.eup %1250  ;;  %v786_v45 = vsel %vm783_vm3, %v785_v44, %v781_v42 }
 0x1e9   : > { %v759_v49 = vmul.f32 %v1251_v39, %v756_v35  ;;  %v1253_v51 = vpop.eup %1252  ;;  %vm764_vm4 = vweird.f32 %v1251_v39 }
 0x1ea   : > { %v637_v53 = vadd.f32 1.0, %v1253_v51  ;;  %vm765_vm6 = vmor %vm763_vm5, %vm764_vm4 }
 0x1eb   : > { %v760_v48 = vsub.f32 1.0, %v759_v49 }
 0x1ec   : > { %1254 = vrcp.f32 %v637_v53  ;;  %vm658_vm8 = vweird.f32 %v637_v53  ;;  %v664_v4 = vand.u32 2147483648, %v637_v53  ;;  %v662_v6 = vand.u32 2147483647, %v637_v53 }
 0x1ed   : > { %v761_v50 = vmul.f32 %v1251_v39, %v760_v48  ;;  %1256 = vpow2.f32 %v1111_v15 }
 0x1ee   : > { %v665_v7 = vor.u32 1.1754944e-38, %v664_v4  ;;  %vm663_vm11 = vcmp.eq.f32.partialorder %v662_v6, 8.507059e+37 }
 0x1ef   : > { %v762_v54 = vadd.f32 %v1251_v39, %v761_v50 }
 0x1f1   : > { %v766_v56 = vsel %vm765_vm6, %v1251_v39, %v762_v54 }
 0x1f2   : > { %v771_v60 = vsel %vm768_vm7, %v770_v58, %v766_v56  ;;  %v1255_v0 = vpop.eup %1254 }
 0x1f3   : > { %v654_v1 = vmul.f32 %v1255_v0, %v637_v53  ;;  %vm659_vm9 = vweird.f32 %v1255_v0  ;;  %v1257_v16 = vpop.eup %1256 }
 0x1f4   : > { %vm660_vm10 = vmor %vm658_vm8, %vm659_vm9  ;;  %v636_v17 = vadd.f32 1.0, %v1257_v16 }
 0x1f5   : > { %v655_v2 = vsub.f32 1.0, %v654_v1 }
 0x1f6   : > { %1258 = vrcp.f32 %v636_v17  ;;  %vm643_vm13 = vweird.f32 %v636_v17  ;;  %v649_v61 = vand.u32 2147483648, %v636_v17  ;;  %v647_v24 = vand.u32 2147483647, %v636_v17 }
 0x1f7   : > { %v656_v3 = vmul.f32 %v1255_v0, %v655_v2 }
 0x1f8   : > { %vm648_vm0 = vcmp.eq.f32.partialorder %v647_v24, 8.507059e+37 }
 0x1f9   : > { %v657_v5 = vadd.f32 %v1255_v0, %v656_v3 }
 0x1fb   : > { %v661_v8 = vsel %vm660_vm10, %v1255_v0, %v657_v5 }
 0x1fc   : > { %v666_v9 = vsel %vm663_vm11, %v665_v7, %v661_v8  ;;  %v1259_v19 = vpop.eup %1258 }
 0x1fd   : > { %v639_v20 = vmul.f32 %v1259_v19, %v636_v17  ;;  %vm644_vm14 = vweird.f32 %v1259_v19 }
 0x1fe   : > { %vm645_vm15 = vmor %vm643_vm13, %vm644_vm14 }
 0x1ff   : > { %v640_v21 = vsub.f32 1.0, %v639_v20 }
 0x201   : > { %v641_v22 = vmul.f32 %v1259_v19, %v640_v21 }
 0x203   : > { %v642_v23 = vadd.f32 %v1259_v19, %v641_v22 }
 0x205   : > { %v646_v25 = vsel %vm645_vm15, %v1259_v19, %v642_v23 }
 0x21e   : > { %v819_v46 = vpop.permute.xlu2 %818 }
 0x21f   : > { %v823_v47 = vmul.f32 %v819_v46, %v786_v45 }
 0x221   : > { %828 = vrot.lane.b32.xlu0 %v823_v47, %s1317_s24 }
 0x22e   : > { %v817_v62 = vpop.permute.xlu1 %816 }
 0x22f   : > { %v822_v63 = vmul.f32 %v817_v62, %v771_v60 }
 0x231   : > { %826 = vrot.lane.b32.xlu2 %v822_v63, %s1317_s24 }
 0x239   : > { %841 = vrot.lane.b32.xlu2 %v699_v26, %s1317_s24 }
 0x23e   : > { %v705_v43 = vpop.permute.xlu0 %704 }
 0x247   : > { %v707_v10 = vpop.permute.xlu1 %706 }
 0x248   : > { %v711_v11 = vmul.f32 %v707_v10, %v666_v9 }
 0x24f   : > { %v840_v12 = vpop.permute.xlu1 %839 }
 0x250   : > { %v845_v13 = vsel %vm832_vm12, %v840_v12, %v1667_v14  ;;  %v650_v14 = vor.u32 1.1754944e-38, %v649_v61 }
 0x251   : > { %847 = vst [vmem:[#allocation3 + $0x8] sm:$0xff] %v845_v13 }
 0x252   : > { %v651_v59 = vsel %vm648_vm0, %v650_v14, %v646_v25 }
 0x253   : > { %v710_v26 = vmul.f32 %v705_v43, %v651_v59 }
 0x28b   : > { %v827_v27 = vpop.permute.xlu2 %826 }
 0x28c   : > { %v833_v28 = vsel %vm832_vm12, %v710_v26, %v827_v27 }
 0x28d   : > { %835 = vst [vmem:[#allocation2] sm:$0xff] %v833_v28 }
 0x28e   : > { %849 = vst [vmem:[%s1426_s7] sm:$0xff] %v833_v28 }
 0x293   : > { %v829_v29 = vpop.permute.xlu0 %828  ;;  %v842_v30 = vpop.permute.xlu2 %841 }
 0x294   : > { %v834_v31 = vsel %vm832_vm12, %v711_v11, %v829_v29  ;;  %v846_v32 = vsel %vm832_vm12, %v842_v30, %v1671_v18 }
 0x295   : > { %836 = vst [vmem:[#allocation2 + $0x8] sm:$0xff] %v834_v31 }
 0x296   : > { %850 = vst [vmem:[%s1426_s7 + $0x8] sm:$0xff] %v834_v31 }
 0x297   : > { %848 = vst [vmem:[#allocation3] sm:$0xff] %v846_v32 }
 0x298 PF: > { %s13_s18 = sadd.s32 1, %s1314_s18   ;;  %s1720_s12 = smov %s1294_s13 }
 0x299   : > { %p10_p0 = scmp.ge.s32.totalorder %s13_s18, 18   ;;  %s1721_s13 = smov %s1393_s27 }
 0x29a   : > { %s1722_s14 = smov %s1302_s15  ;;  %s1723_s15 = smov %s1390_s26 }
 0x29b   : > { %s1724_s16 = smov %s1310_s17  ;;  %s1725_s17 = smov %s1727_s19 }
 0x29c   :  { %12 = sbr.rel (!%p10_p0) target bundleno = 4 (0x4), region = 155 }

</bundles_post_ra>
